<compile_context>
chip_gen: v7x
topology: tpu7x:2x2x1
jax: 0.10.0
libtpu: 0.0.40
codegen_flags: <defaults>
</compile_context>

<pallas_src>
import functools

import jax
import jax.numpy as jnp
from jax import lax
from jax.experimental import pallas as pl
from jax.experimental.pallas import tpu as pltpu

LN_EPS = 1e-5                 # PyTorch nn.LayerNorm default
INV_SQRT2 = 0.7071067811865476


def _layernorm(x, gamma, beta):
    # x: (N, C) f32; gamma/beta: (1, C) f32
    mu = jnp.mean(x, axis=-1, keepdims=True)
    xc = x - mu
    var = jnp.mean(xc * xc, axis=-1, keepdims=True)
    return xc * lax.rsqrt(var + LN_EPS) * gamma + beta


def _gelu_exact(x):
    # torch.nn.GELU default = exact (erf) variant
    return 0.5 * x * (1.0 + lax.erf(x * INV_SQRT2))


def block_kernel(x_ref, w_qkv_ref, w_proj_ref, b_proj_ref,
                 g1_ref, b1_ref, g2_ref, b2_ref,
                 w_fc1_ref, b_fc1_ref, w_fc2_ref, b_fc2_ref,
                 o_ref, y_acc_ref, *, num_heads, head_dim, qk_scale, compute_dtype):
    cd = compute_dtype
    C = num_heads * head_dim

    # Residual / LayerNorm math stays in f32 even if x arrives in bf16.
    x = x_ref[0].astype(jnp.float32)                      # (N, C)

    # ---------- norm1 + QKV projection (single big K=C matmul) ----------
    xn = _layernorm(x, g1_ref[...], b1_ref[...])
    qkv = jnp.dot(xn.astype(cd), w_qkv_ref[...],
                  preferred_element_type=jnp.float32)     # (N, 3C) f32
    # Column order matches torch .reshape(B,N,3,H,hd): [q_h0..q_hH | k_h0.. | v_h0..]
    q = (qkv[:, :C] * qk_scale).astype(cd)                # scale & 1/temperature folded in
    k = qkv[:, C:2 * C].astype(cd)
    v = qkv[:, 2 * C:].astype(cd)

    # ---------- per-head attention ----------
    for h in range(num_heads):
        sl = slice(h * head_dim, (h + 1) * head_dim)
        qh, kh, vh = q[:, sl], k[:, sl], v[:, sl]          # (N, hd) each
        # q @ k^T without materializing a transpose: contract the last dims directly.
        s = lax.dot_general(qh, kh, (((1,), (1,)), ((), ())),
                            preferred_element_type=jnp.float32)       # (N, N)
        s = s - jnp.max(s, axis=-1, keepdims=True)
        p = jnp.exp(s)
        p = p * pl.reciprocal(jnp.sum(p, axis=-1, keepdims=True), approx=True)
        ho = jnp.dot(p.astype(cd), vh, preferred_element_type=jnp.float32)  # (N, hd)
        # Write this head's output straight into its lane slice of the scratch slab:
        # no jnp.concatenate, and the head's live range ends here.
        y_acc_ref[:, sl] = ho.astype(y_acc_ref.dtype)

    # ---------- output projection (single K=C matmul) + residual 1 ----------
    y = jnp.dot(y_acc_ref[...], w_proj_ref[...],
                preferred_element_type=jnp.float32) + b_proj_ref[...]
    # NOTE: the torch module's `magnitudes` / attention maps are only returned when
    # return_attention=True; they do not affect the default forward output.
    x1 = x + y

    # ---------- norm2 + MLP + residual 2 ----------
    xn2 = _layernorm(x1, g2_ref[...], b2_ref[...])
    h1 = jnp.dot(xn2.astype(cd), w_fc1_ref[...],
                 preferred_element_type=jnp.float32) + b_fc1_ref[...]
    h1 = _gelu_exact(h1)
    m = jnp.dot(h1.astype(cd), w_fc2_ref[...],
                preferred_element_type=jnp.float32) + b_fc2_ref[...]

    o_ref[0] = (x1 + m).astype(o_ref.dtype)


def vit_block(x, params, *, num_heads, attn_temperature=1.0,
              compute_dtype=jnp.bfloat16):
    B, N, C = x.shape
    head_dim = C // num_heads
    hidden = params["w_fc1"].shape[1]
    cd = jnp.dtype(compute_dtype)

    # Matmul operands (weights) in compute_dtype (bf16 -> MXU-native on v6e/v7x and
    # half the weight VMEM); vector-path params (biases, LN affine) stay f32.
    w_qkv = params["w_qkv"].astype(cd)
    w_proj = params["w_proj"].astype(cd)
    w_fc1 = params["w_fc1"].astype(cd)
    w_fc2 = params["w_fc2"].astype(cd)
    b_proj = params["b_proj"].astype(jnp.float32)
    b_fc1 = params["b_fc1"].astype(jnp.float32)
    b_fc2 = params["b_fc2"].astype(jnp.float32)
    g1 = params["g1"].astype(jnp.float32)
    b1 = params["b1"].astype(jnp.float32)
    g2 = params["g2"].astype(jnp.float32)
    b2 = params["b2"].astype(jnp.float32)
    flat_params = (w_qkv, w_proj, b_proj, g1, b1, g2, b2, w_fc1, b_fc1, w_fc2, b_fc2)

    kernel = functools.partial(
        block_kernel, num_heads=num_heads, head_dim=head_dim,
        qk_scale=float(head_dim ** -0.5) / float(attn_temperature),
        compute_dtype=cd)

    def full(shape):
        return pl.BlockSpec(shape, lambda b: (0,) * len(shape))

    in_specs = [
        pl.BlockSpec((1, N, C), lambda b: (b, 0, 0)),   # x
        full((C, 3 * C)),                               # w_qkv   (in, out)
        full((C, C)),                                   # w_proj  (in, out)
        full((1, C)),                                   # b_proj
        full((1, C)), full((1, C)),                     # norm1 gamma, beta
        full((1, C)), full((1, C)),                     # norm2 gamma, beta
        full((C, hidden)), full((1, hidden)),           # fc1 w, b
        full((hidden, C)), full((1, C)),                # fc2 w, b
    ]

    # --- scheduler hint ---
    flops = 2 * B * (N * C * 3 * C                       # QKV projection
                     + num_heads * 2 * N * N * head_dim  # scores + PV
                     + N * C * C                         # output projection
                     + 2 * N * C * hidden)               # MLP
    transcendentals = B * (num_heads * N * N + N * hidden)   # exp + erf
    param_bytes = sum(int(p.nbytes) for p in flat_params)
    bytes_accessed = 2 * int(x.nbytes) + param_bytes
    cost = pl.CostEstimate(flops=int(flops),
                           transcendentals=int(transcendentals),
                           bytes_accessed=int(bytes_accessed))

    # --- scoped-VMEM sizing (weights x2 buffers + io blocks x2 + f32 intermediates) ---
    itemsize = jnp.dtype(x.dtype).itemsize
    block_io = 2 * N * C * itemsize
    interm_f32 = 4 * (N * 3 * C          # qkv
                      + 3 * N * C        # q/k/v casts
                      + 2 * N * N        # scores + probs (one head live at a time)
                      + 3 * N * C        # y_acc / y / x1
                      + 2 * N * hidden)  # fc1 activation + gelu
    vmem_est = 2 * (param_bytes + block_io) + 2 * interm_f32
    vmem_limit = int(min(max(vmem_est, 32 * 2 ** 20), 64 * 2 ** 20))

    return pl.pallas_call(
        kernel,
        out_shape=jax.ShapeDtypeStruct((B, N, C), x.dtype),
        grid=(B,),
        in_specs=in_specs,
        out_specs=pl.BlockSpec((1, N, C), lambda b: (b, 0, 0)),
        scratch_shapes=[pltpu.VMEM((N, C), cd)],        # per-head output slab
        compiler_params=pltpu.CompilerParams(
            dimension_semantics=("parallel",),
            vmem_limit_bytes=vmem_limit),
        cost_estimate=cost,
    )(x, *flat_params)


# ------------------------ pure-JAX reference (for verification) ------------------------
def ref_block(x, params, *, num_heads, attn_temperature=1.0):
    B, N, C = x.shape
    hd = C // num_heads
    scale = hd ** -0.5

    def ln(z, g, b):
        mu = jnp.mean(z, axis=-1, keepdims=True)
        var = jnp.mean((z - mu) ** 2, axis=-1, keepdims=True)
        return (z - mu) / jnp.sqrt(var + LN_EPS) * g + b

    xn = ln(x, params["g1"], params["b1"])
    qkv = xn @ params["w_qkv"]                                  # (B, N, 3C)
    qkv = qkv.reshape(B, N, 3, num_heads, hd).transpose(2, 0, 3, 1, 4)
    q, k, v = qkv[0], qkv[1], qkv[2]                            # (B, H, N, hd)
    attn = (q * scale) @ jnp.swapaxes(k, -1, -2) / attn_temperature
    attn = jax.nn.softmax(attn, axis=-1)
    y = attn @ v                                                # (B, H, N, hd)
    y = jnp.swapaxes(y, 1, 2).reshape(B, N, C)
    y = y @ params["w_proj"] + params["b_proj"]
    x1 = x + y
    xn2 = ln(x1, params["g2"], params["b2"])
    h1 = xn2 @ params["w_fc1"] + params["b_fc1"]
    h1 = 0.5 * h1 * (1.0 + lax.erf(h1 / jnp.sqrt(2.0)))
    m = h1 @ params["w_fc2"] + params["b_fc2"]
    return x1 + m


if __name__ == "__main__":
    B, N, C = 2, 8, 32
    num_heads = 4
    mlp_ratio = 4.0
    hidden = int(C * mlp_ratio)

    key = jax.random.PRNGKey(0)
    ks = jax.random.split(key, 12)
    x = jax.random.normal(ks[0], (B, N, C), jnp.float32)

    # Deterministic synthetic parameters (PyTorch Linear weight is (out, in); we
    # transpose to (in, out) so the kernel does x @ W).
    w_qkv_pt = 0.05 * jax.random.normal(ks[1], (3 * C, C), jnp.float32)
    w_proj_pt = 0.05 * jax.random.normal(ks[2], (C, C), jnp.float32)
    b_proj = 0.02 * jax.random.normal(ks[3], (C,), jnp.float32)
    w_fc1_pt = 0.05 * jax.random.normal(ks[4], (hidden, C), jnp.float32)
    b_fc1 = 0.02 * jax.random.normal(ks[5], (hidden,), jnp.float32)
    w_fc2_pt = 0.05 * jax.random.normal(ks[6], (C, hidden), jnp.float32)
    b_fc2 = 0.02 * jax.random.normal(ks[7], (C,), jnp.float32)
    g1 = 1.0 + 0.1 * jax.random.normal(ks[8], (C,), jnp.float32)
    b1 = 0.1 * jax.random.normal(ks[9], (C,), jnp.float32)
    g2 = 1.0 + 0.1 * jax.random.normal(ks[10], (C,), jnp.float32)
    b2 = 0.1 * jax.random.normal(ks[11], (C,), jnp.float32)

    params = dict(
        w_qkv=w_qkv_pt.T, w_proj=w_proj_pt.T,
        b_proj=b_proj.reshape(1, C),
        g1=g1.reshape(1, C), b1=b1.reshape(1, C),
        g2=g2.reshape(1, C), b2=b2.reshape(1, C),
        w_fc1=w_fc1_pt.T, b_fc1=b_fc1.reshape(1, hidden),
        w_fc2=w_fc2_pt.T, b_fc2=b_fc2.reshape(1, C),
    )

    # Production path: bf16 matmul operands, f32 accumulation / vector math.
    out_bf16 = vit_block(x, params, num_heads=num_heads, attn_temperature=1.0)
    # Full-precision path for a tight correctness check.
    out_f32 = vit_block(x, params, num_heads=num_heads, attn_temperature=1.0,
                        compute_dtype=jnp.float32)
    out_bf16, out_f32 = jax.block_until_ready((out_bf16, out_f32))

    ref = ref_block(x, params, num_heads=num_heads, attn_temperature=1.0)
    assert out_bf16.shape == (B, N, C) and out_f32.shape == (B, N, C)
    assert jnp.allclose(out_f32, ref, atol=2e-3, rtol=2e-3), "f32 kernel mismatch vs reference"
    assert jnp.allclose(out_bf16.astype(jnp.float32), ref, atol=3e-2, rtol=3e-2), \
        "bf16 kernel mismatch vs reference"

    print("KERNEL_OK")
</pallas_src>

<mosaic_0001>
module attributes {stable_mosaic.version = 11 : i64} {
  func.func @block_kernel(%arg0: i32, %arg1: memref<1x8x32xf32, #tpu.memory_space<vmem>>, %arg2: memref<32x96xbf16, #tpu.memory_space<vmem>>, %arg3: memref<32x32xbf16, #tpu.memory_space<vmem>>, %arg4: memref<1x32xf32, #tpu.memory_space<vmem>>, %arg5: memref<1x32xf32, #tpu.memory_space<vmem>>, %arg6: memref<1x32xf32, #tpu.memory_space<vmem>>, %arg7: memref<1x32xf32, #tpu.memory_space<vmem>>, %arg8: memref<1x32xf32, #tpu.memory_space<vmem>>, %arg9: memref<32x128xbf16, #tpu.memory_space<vmem>>, %arg10: memref<1x128xf32, #tpu.memory_space<vmem>>, %arg11: memref<128x32xbf16, #tpu.memory_space<vmem>>, %arg12: memref<1x32xf32, #tpu.memory_space<vmem>>, %arg13: memref<1x8x32xf32, #tpu.memory_space<vmem>>, %arg14: memref<8x32xbf16, #tpu.memory_space<vmem>>) attributes {dimension_semantics = [#tpu.dimension_semantics<parallel>], iteration_bounds = array<i64: 2>, scalar_prefetch = 0 : i64, scratch_operands = 1 : i64, tpu.core_type = #tpu.core_type<tc>, window_params = [{transform_indices = @transform_0, window_bounds = array<i64: 1, 8, 32>}, {pipeline_mode = #tpu.pipeline_mode<synchronous>, transform_indices = @transform_1, window_bounds = array<i64: 32, 96>}, {pipeline_mode = #tpu.pipeline_mode<synchronous>, transform_indices = @transform_2, window_bounds = array<i64: 32, 32>}, {pipeline_mode = #tpu.pipeline_mode<synchronous>, transform_indices = @transform_3, window_bounds = array<i64: 1, 32>}, {pipeline_mode = #tpu.pipeline_mode<synchronous>, transform_indices = @transform_4, window_bounds = array<i64: 1, 32>}, {pipeline_mode = #tpu.pipeline_mode<synchronous>, transform_indices = @transform_5, window_bounds = array<i64: 1, 32>}, {pipeline_mode = #tpu.pipeline_mode<synchronous>, transform_indices = @transform_6, window_bounds = array<i64: 1, 32>}, {pipeline_mode = #tpu.pipeline_mode<synchronous>, transform_indices = @transform_7, window_bounds = array<i64: 1, 32>}, {pipeline_mode = #tpu.pipeline_mode<synchronous>, transform_indices = @transform_8, window_bounds = array<i64: 32, 128>}, {pipeline_mode = #tpu.pipeline_mode<synchronous>, transform_indices = @transform_9, window_bounds = array<i64: 1, 128>}, {pipeline_mode = #tpu.pipeline_mode<synchronous>, transform_indices = @transform_10, window_bounds = array<i64: 128, 32>}, {pipeline_mode = #tpu.pipeline_mode<synchronous>, transform_indices = @transform_11, window_bounds = array<i64: 1, 32>}, {transform_indices = @transform_12, window_bounds = array<i64: 1, 8, 32>}]} {
    %c0 = arith.constant 0 : index
    %c0_0 = arith.constant 0 : index
    %c0_1 = arith.constant 0 : index
    %0 = vector.load %arg1[%c0, %c0_0, %c0_1] : memref<1x8x32xf32, #tpu.memory_space<vmem>>, vector<1x8x32xf32>
    %1 = vector.shape_cast %0 : vector<1x8x32xf32> to vector<8x32xf32>
    %c0_2 = arith.constant 0 : index
    %c0_3 = arith.constant 0 : index
    %2 = vector.load %arg5[%c0_2, %c0_3] : memref<1x32xf32, #tpu.memory_space<vmem>>, vector<1x32xf32>
    %c0_4 = arith.constant 0 : index
    %c0_5 = arith.constant 0 : index
    %3 = vector.load %arg6[%c0_4, %c0_5] : memref<1x32xf32, #tpu.memory_space<vmem>>, vector<1x32xf32>
    %cst = arith.constant dense<0.000000e+00> : vector<8xf32>
    %4 = vector.multi_reduction <add>, %1, %cst [1] : vector<8x32xf32> to vector<8xf32>
    %5 = vector.shape_cast %4 : vector<8xf32> to vector<8x1xf32>
    %cst_6 = arith.constant 3.200000e+01 : f32
    %6 = vector.broadcast %cst_6 : f32 to vector<8x1xf32>
    %7 = arith.divf %5, %6 : vector<8x1xf32>
    %8 = vector.broadcast %7 : vector<8x1xf32> to vector<8x32xf32>
    %9 = arith.subf %1, %8 : vector<8x32xf32>
    %10 = arith.mulf %9, %9 : vector<8x32xf32>
    %cst_7 = arith.constant dense<0.000000e+00> : vector<8xf32>
    %11 = vector.multi_reduction <add>, %10, %cst_7 [1] : vector<8x32xf32> to vector<8xf32>
    %12 = vector.shape_cast %11 : vector<8xf32> to vector<8x1xf32>
    %cst_8 = arith.constant 3.200000e+01 : f32
    %13 = vector.broadcast %cst_8 : f32 to vector<8x1xf32>
    %14 = arith.divf %12, %13 : vector<8x1xf32>
    %cst_9 = arith.constant 9.99999974E-6 : f32
    %15 = vector.broadcast %cst_9 : f32 to vector<8x1xf32>
    %16 = arith.addf %14, %15 : vector<8x1xf32>
    %17 = math.rsqrt %16 : vector<8x1xf32>
    %18 = vector.broadcast %17 : vector<8x1xf32> to vector<8x32xf32>
    %19 = arith.mulf %9, %18 : vector<8x32xf32>
    %20 = vector.broadcast %2 : vector<1x32xf32> to vector<8x32xf32>
    %21 = arith.mulf %19, %20 : vector<8x32xf32>
    %22 = vector.broadcast %3 : vector<1x32xf32> to vector<8x32xf32>
    %23 = arith.addf %21, %22 : vector<8x32xf32>
    %24 = arith.truncf %23 : vector<8x32xf32> to vector<8x32xbf16>
    %c0_10 = arith.constant 0 : index
    %c0_11 = arith.constant 0 : index
    %25 = vector.load %arg2[%c0_10, %c0_11] : memref<32x96xbf16, #tpu.memory_space<vmem>>, vector<32x96xbf16>
    %cst_12 = arith.constant dense<0.000000e+00> : vector<8x96xf32>
    %26 = tpu.matmul %24, %25, %cst_12 {dimension_numbers = #tpu.dot_dimension_numbers<[1], [0], [0], [1], [0, 0, 1, 1], [], []>} : vector<8x32xbf16>, vector<32x96xbf16>, vector<8x96xf32> -> vector<8x96xf32>
    %27 = vector.extract_strided_slice %26 {offsets = [0, 0], sizes = [8, 32], strides = [1, 1]} : vector<8x96xf32> to vector<8x32xf32>
    %cst_13 = arith.constant 0.353553385 : f32
    %28 = vector.broadcast %cst_13 : f32 to vector<8x32xf32>
    %29 = arith.mulf %27, %28 : vector<8x32xf32>
    %30 = arith.truncf %29 : vector<8x32xf32> to vector<8x32xbf16>
    %31 = vector.extract_strided_slice %26 {offsets = [0, 32], sizes = [8, 32], strides = [1, 1]} : vector<8x96xf32> to vector<8x32xf32>
    %32 = arith.truncf %31 : vector<8x32xf32> to vector<8x32xbf16>
    %33 = vector.extract_strided_slice %26 {offsets = [0, 64], sizes = [8, 32], strides = [1, 1]} : vector<8x96xf32> to vector<8x32xf32>
    %34 = arith.truncf %33 : vector<8x32xf32> to vector<8x32xbf16>
    %35 = vector.extract_strided_slice %30 {offsets = [0, 0], sizes = [8, 8], strides = [1, 1]} : vector<8x32xbf16> to vector<8x8xbf16>
    %36 = vector.extract_strided_slice %32 {offsets = [0, 0], sizes = [8, 8], strides = [1, 1]} : vector<8x32xbf16> to vector<8x8xbf16>
    %37 = vector.extract_strided_slice %34 {offsets = [0, 0], sizes = [8, 8], strides = [1, 1]} : vector<8x32xbf16> to vector<8x8xbf16>
    %cst_14 = arith.constant dense<0.000000e+00> : vector<8x8xf32>
    %38 = tpu.matmul %35, %36, %cst_14 {dimension_numbers = #tpu.dot_dimension_numbers<[1], [1], [0], [0], [0, 0, 1, 0], [], []>} : vector<8x8xbf16>, vector<8x8xbf16>, vector<8x8xf32> -> vector<8x8xf32>
    %cst_15 = arith.constant dense<0xFF800000> : vector<8xf32>
    %39 = vector.multi_reduction <maximumf>, %38, %cst_15 [1] : vector<8x8xf32> to vector<8xf32>
    %40 = vector.shape_cast %39 : vector<8xf32> to vector<8x1xf32>
    %41 = vector.broadcast %40 : vector<8x1xf32> to vector<8x8xf32>
    %42 = arith.subf %38, %41 : vector<8x8xf32>
    %43 = math.exp %42 : vector<8x8xf32>
    %cst_16 = arith.constant dense<0.000000e+00> : vector<8xf32>
    %44 = vector.multi_reduction <add>, %43, %cst_16 [1] : vector<8x8xf32> to vector<8xf32>
    %45 = vector.shape_cast %44 : vector<8xf32> to vector<8x1xf32>
    %46 = tpu.reciprocal %45 {approx = true} : vector<8x1xf32> -> vector<8x1xf32>
    %47 = vector.broadcast %46 : vector<8x1xf32> to vector<8x8xf32>
    %48 = arith.mulf %43, %47 : vector<8x8xf32>
    %49 = arith.truncf %48 : vector<8x8xf32> to vector<8x8xbf16>
    %cst_17 = arith.constant dense<0.000000e+00> : vector<8x8xf32>
    %50 = tpu.matmul %49, %37, %cst_17 {dimension_numbers = #tpu.dot_dimension_numbers<[1], [0], [0], [1], [0, 0, 1, 1], [], []>} : vector<8x8xbf16>, vector<8x8xbf16>, vector<8x8xf32> -> vector<8x8xf32>
    %51 = arith.truncf %50 : vector<8x8xf32> to vector<8x8xbf16>
    %c0_18 = arith.constant 0 : index
    %c0_19 = arith.constant 0 : index
    %52 = vector.load %arg14[%c0_18, %c0_19] : memref<8x32xbf16, #tpu.memory_space<vmem>>, vector<8x8xbf16>
    tpu.vector_store %arg14[%c0_18, %c0_19], %51 {strides = array<i32>} : memref<8x32xbf16, #tpu.memory_space<vmem>>, vector<8x8xbf16>,
    %53 = vector.extract_strided_slice %30 {offsets = [0, 8], sizes = [8, 8], strides = [1, 1]} : vector<8x32xbf16> to vector<8x8xbf16>
    %54 = vector.extract_strided_slice %32 {offsets = [0, 8], sizes = [8, 8], strides = [1, 1]} : vector<8x32xbf16> to vector<8x8xbf16>
    %55 = vector.extract_strided_slice %34 {offsets = [0, 8], sizes = [8, 8], strides = [1, 1]} : vector<8x32xbf16> to vector<8x8xbf16>
    %cst_20 = arith.constant dense<0.000000e+00> : vector<8x8xf32>
    %56 = tpu.matmul %53, %54, %cst_20 {dimension_numbers = #tpu.dot_dimension_numbers<[1], [1], [0], [0], [0, 0, 1, 0], [], []>} : vector<8x8xbf16>, vector<8x8xbf16>, vector<8x8xf32> -> vector<8x8xf32>
    %cst_21 = arith.constant dense<0xFF800000> : vector<8xf32>
    %57 = vector.multi_reduction <maximumf>, %56, %cst_21 [1] : vector<8x8xf32> to vector<8xf32>
    %58 = vector.shape_cast %57 : vector<8xf32> to vector<8x1xf32>
    %59 = vector.broadcast %58 : vector<8x1xf32> to vector<8x8xf32>
    %60 = arith.subf %56, %59 : vector<8x8xf32>
    %61 = math.exp %60 : vector<8x8xf32>
    %cst_22 = arith.constant dense<0.000000e+00> : vector<8xf32>
    %62 = vector.multi_reduction <add>, %61, %cst_22 [1] : vector<8x8xf32> to vector<8xf32>
    %63 = vector.shape_cast %62 : vector<8xf32> to vector<8x1xf32>
    %64 = tpu.reciprocal %63 {approx = true} : vector<8x1xf32> -> vector<8x1xf32>
    %65 = vector.broadcast %64 : vector<8x1xf32> to vector<8x8xf32>
    %66 = arith.mulf %61, %65 : vector<8x8xf32>
    %67 = arith.truncf %66 : vector<8x8xf32> to vector<8x8xbf16>
    %cst_23 = arith.constant dense<0.000000e+00> : vector<8x8xf32>
    %68 = tpu.matmul %67, %55, %cst_23 {dimension_numbers = #tpu.dot_dimension_numbers<[1], [0], [0], [1], [0, 0, 1, 1], [], []>} : vector<8x8xbf16>, vector<8x8xbf16>, vector<8x8xf32> -> vector<8x8xf32>
    %69 = arith.truncf %68 : vector<8x8xf32> to vector<8x8xbf16>
    %c0_24 = arith.constant 0 : index
    %c8 = arith.constant 8 : index
    %70 = vector.load %arg14[%c0_24, %c8] : memref<8x32xbf16, #tpu.memory_space<vmem>>, vector<8x8xbf16>
    tpu.vector_store %arg14[%c0_24, %c8], %69 {strides = array<i32>} : memref<8x32xbf16, #tpu.memory_space<vmem>>, vector<8x8xbf16>,
    %71 = vector.extract_strided_slice %30 {offsets = [0, 16], sizes = [8, 8], strides = [1, 1]} : vector<8x32xbf16> to vector<8x8xbf16>
    %72 = vector.extract_strided_slice %32 {offsets = [0, 16], sizes = [8, 8], strides = [1, 1]} : vector<8x32xbf16> to vector<8x8xbf16>
    %73 = vector.extract_strided_slice %34 {offsets = [0, 16], sizes = [8, 8], strides = [1, 1]} : vector<8x32xbf16> to vector<8x8xbf16>
    %cst_25 = arith.constant dense<0.000000e+00> : vector<8x8xf32>
    %74 = tpu.matmul %71, %72, %cst_25 {dimension_numbers = #tpu.dot_dimension_numbers<[1], [1], [0], [0], [0, 0, 1, 0], [], []>} : vector<8x8xbf16>, vector<8x8xbf16>, vector<8x8xf32> -> vector<8x8xf32>
    %cst_26 = arith.constant dense<0xFF800000> : vector<8xf32>
    %75 = vector.multi_reduction <maximumf>, %74, %cst_26 [1] : vector<8x8xf32> to vector<8xf32>
    %76 = vector.shape_cast %75 : vector<8xf32> to vector<8x1xf32>
    %77 = vector.broadcast %76 : vector<8x1xf32> to vector<8x8xf32>
    %78 = arith.subf %74, %77 : vector<8x8xf32>
    %79 = math.exp %78 : vector<8x8xf32>
    %cst_27 = arith.constant dense<0.000000e+00> : vector<8xf32>
    %80 = vector.multi_reduction <add>, %79, %cst_27 [1] : vector<8x8xf32> to vector<8xf32>
    %81 = vector.shape_cast %80 : vector<8xf32> to vector<8x1xf32>
    %82 = tpu.reciprocal %81 {approx = true} : vector<8x1xf32> -> vector<8x1xf32>
    %83 = vector.broadcast %82 : vector<8x1xf32> to vector<8x8xf32>
    %84 = arith.mulf %79, %83 : vector<8x8xf32>
    %85 = arith.truncf %84 : vector<8x8xf32> to vector<8x8xbf16>
    %cst_28 = arith.constant dense<0.000000e+00> : vector<8x8xf32>
    %86 = tpu.matmul %85, %73, %cst_28 {dimension_numbers = #tpu.dot_dimension_numbers<[1], [0], [0], [1], [0, 0, 1, 1], [], []>} : vector<8x8xbf16>, vector<8x8xbf16>, vector<8x8xf32> -> vector<8x8xf32>
    %87 = arith.truncf %86 : vector<8x8xf32> to vector<8x8xbf16>
    %c0_29 = arith.constant 0 : index
    %c16 = arith.constant 16 : index
    %88 = vector.load %arg14[%c0_29, %c16] : memref<8x32xbf16, #tpu.memory_space<vmem>>, vector<8x8xbf16>
    tpu.vector_store %arg14[%c0_29, %c16], %87 {strides = array<i32>} : memref<8x32xbf16, #tpu.memory_space<vmem>>, vector<8x8xbf16>,
    %89 = vector.extract_strided_slice %30 {offsets = [0, 24], sizes = [8, 8], strides = [1, 1]} : vector<8x32xbf16> to vector<8x8xbf16>
    %90 = vector.extract_strided_slice %32 {offsets = [0, 24], sizes = [8, 8], strides = [1, 1]} : vector<8x32xbf16> to vector<8x8xbf16>
    %91 = vector.extract_strided_slice %34 {offsets = [0, 24], sizes = [8, 8], strides = [1, 1]} : vector<8x32xbf16> to vector<8x8xbf16>
    %cst_30 = arith.constant dense<0.000000e+00> : vector<8x8xf32>
    %92 = tpu.matmul %89, %90, %cst_30 {dimension_numbers = #tpu.dot_dimension_numbers<[1], [1], [0], [0], [0, 0, 1, 0], [], []>} : vector<8x8xbf16>, vector<8x8xbf16>, vector<8x8xf32> -> vector<8x8xf32>
    %cst_31 = arith.constant dense<0xFF800000> : vector<8xf32>
    %93 = vector.multi_reduction <maximumf>, %92, %cst_31 [1] : vector<8x8xf32> to vector<8xf32>
    %94 = vector.shape_cast %93 : vector<8xf32> to vector<8x1xf32>
    %95 = vector.broadcast %94 : vector<8x1xf32> to vector<8x8xf32>
    %96 = arith.subf %92, %95 : vector<8x8xf32>
    %97 = math.exp %96 : vector<8x8xf32>
    %cst_32 = arith.constant dense<0.000000e+00> : vector<8xf32>
    %98 = vector.multi_reduction <add>, %97, %cst_32 [1] : vector<8x8xf32> to vector<8xf32>
    %99 = vector.shape_cast %98 : vector<8xf32> to vector<8x1xf32>
    %100 = tpu.reciprocal %99 {approx = true} : vector<8x1xf32> -> vector<8x1xf32>
    %101 = vector.broadcast %100 : vector<8x1xf32> to vector<8x8xf32>
    %102 = arith.mulf %97, %101 : vector<8x8xf32>
    %103 = arith.truncf %102 : vector<8x8xf32> to vector<8x8xbf16>
    %cst_33 = arith.constant dense<0.000000e+00> : vector<8x8xf32>
    %104 = tpu.matmul %103, %91, %cst_33 {dimension_numbers = #tpu.dot_dimension_numbers<[1], [0], [0], [1], [0, 0, 1, 1], [], []>} : vector<8x8xbf16>, vector<8x8xbf16>, vector<8x8xf32> -> vector<8x8xf32>
    %105 = arith.truncf %104 : vector<8x8xf32> to vector<8x8xbf16>
    %c0_34 = arith.constant 0 : index
    %c24 = arith.constant 24 : index
    %106 = vector.load %arg14[%c0_34, %c24] : memref<8x32xbf16, #tpu.memory_space<vmem>>, vector<8x8xbf16>
    tpu.vector_store %arg14[%c0_34, %c24], %105 {strides = array<i32>} : memref<8x32xbf16, #tpu.memory_space<vmem>>, vector<8x8xbf16>,
    %c0_35 = arith.constant 0 : index
    %c0_36 = arith.constant 0 : index
    %107 = vector.load %arg14[%c0_35, %c0_36] : memref<8x32xbf16, #tpu.memory_space<vmem>>, vector<8x32xbf16>
    %c0_37 = arith.constant 0 : index
    %c0_38 = arith.constant 0 : index
    %108 = vector.load %arg3[%c0_37, %c0_38] : memref<32x32xbf16, #tpu.memory_space<vmem>>, vector<32x32xbf16>
    %cst_39 = arith.constant dense<0.000000e+00> : vector<8x32xf32>
    %109 = tpu.matmul %107, %108, %cst_39 {dimension_numbers = #tpu.dot_dimension_numbers<[1], [0], [0], [1], [0, 0, 1, 1], [], []>} : vector<8x32xbf16>, vector<32x32xbf16>, vector<8x32xf32> -> vector<8x32xf32>
    %c0_40 = arith.constant 0 : index
    %c0_41 = arith.constant 0 : index
    %110 = vector.load %arg4[%c0_40, %c0_41] : memref<1x32xf32, #tpu.memory_space<vmem>>, vector<1x32xf32>
    %111 = vector.broadcast %110 : vector<1x32xf32> to vector<8x32xf32>
    %112 = arith.addf %109, %111 : vector<8x32xf32>
    %113 = arith.addf %1, %112 : vector<8x32xf32>
    %c0_42 = arith.constant 0 : index
    %c0_43 = arith.constant 0 : index
    %114 = vector.load %arg7[%c0_42, %c0_43] : memref<1x32xf32, #tpu.memory_space<vmem>>, vector<1x32xf32>
    %c0_44 = arith.constant 0 : index
    %c0_45 = arith.constant 0 : index
    %115 = vector.load %arg8[%c0_44, %c0_45] : memref<1x32xf32, #tpu.memory_space<vmem>>, vector<1x32xf32>
    %cst_46 = arith.constant dense<0.000000e+00> : vector<8xf32>
    %116 = vector.multi_reduction <add>, %113, %cst_46 [1] : vector<8x32xf32> to vector<8xf32>
    %117 = vector.shape_cast %116 : vector<8xf32> to vector<8x1xf32>
    %cst_47 = arith.constant 3.200000e+01 : f32
    %118 = vector.broadcast %cst_47 : f32 to vector<8x1xf32>
    %119 = arith.divf %117, %118 : vector<8x1xf32>
    %120 = vector.broadcast %119 : vector<8x1xf32> to vector<8x32xf32>
    %121 = arith.subf %113, %120 : vector<8x32xf32>
    %122 = arith.mulf %121, %121 : vector<8x32xf32>
    %cst_48 = arith.constant dense<0.000000e+00> : vector<8xf32>
    %123 = vector.multi_reduction <add>, %122, %cst_48 [1] : vector<8x32xf32> to vector<8xf32>
    %124 = vector.shape_cast %123 : vector<8xf32> to vector<8x1xf32>
    %cst_49 = arith.constant 3.200000e+01 : f32
    %125 = vector.broadcast %cst_49 : f32 to vector<8x1xf32>
    %126 = arith.divf %124, %125 : vector<8x1xf32>
    %cst_50 = arith.constant 9.99999974E-6 : f32
    %127 = vector.broadcast %cst_50 : f32 to vector<8x1xf32>
    %128 = arith.addf %126, %127 : vector<8x1xf32>
    %129 = math.rsqrt %128 : vector<8x1xf32>
    %130 = vector.broadcast %129 : vector<8x1xf32> to vector<8x32xf32>
    %131 = arith.mulf %121, %130 : vector<8x32xf32>
    %132 = vector.broadcast %114 : vector<1x32xf32> to vector<8x32xf32>
    %133 = arith.mulf %131, %132 : vector<8x32xf32>
    %134 = vector.broadcast %115 : vector<1x32xf32> to vector<8x32xf32>
    %135 = arith.addf %133, %134 : vector<8x32xf32>
    %136 = arith.truncf %135 : vector<8x32xf32> to vector<8x32xbf16>
    %c0_51 = arith.constant 0 : index
    %c0_52 = arith.constant 0 : index
    %137 = vector.load %arg9[%c0_51, %c0_52] : memref<32x128xbf16, #tpu.memory_space<vmem>>, vector<32x128xbf16>
    %cst_53 = arith.constant dense<0.000000e+00> : vector<8x128xf32>
    %138 = tpu.matmul %136, %137, %cst_53 {dimension_numbers = #tpu.dot_dimension_numbers<[1], [0], [0], [1], [0, 0, 1, 1], [], []>} : vector<8x32xbf16>, vector<32x128xbf16>, vector<8x128xf32> -> vector<8x128xf32>
    %c0_54 = arith.constant 0 : index
    %c0_55 = arith.constant 0 : index
    %139 = vector.load %arg10[%c0_54, %c0_55] : memref<1x128xf32, #tpu.memory_space<vmem>>, vector<1x128xf32>
    %140 = vector.broadcast %139 : vector<1x128xf32> to vector<8x128xf32>
    %141 = arith.addf %138, %140 : vector<8x128xf32>
    %cst_56 = arith.constant 5.000000e-01 : f32
    %142 = vector.broadcast %cst_56 : f32 to vector<8x128xf32>
    %143 = arith.mulf %142, %141 : vector<8x128xf32>
    %cst_57 = arith.constant 0.707106769 : f32
    %144 = vector.broadcast %cst_57 : f32 to vector<8x128xf32>
    %145 = arith.mulf %141, %144 : vector<8x128xf32>
    %146 = math.erf %145 : vector<8x128xf32>
    %cst_58 = arith.constant 1.000000e+00 : f32
    %147 = vector.broadcast %cst_58 : f32 to vector<8x128xf32>
    %148 = arith.addf %147, %146 : vector<8x128xf32>
    %149 = arith.mulf %143, %148 : vector<8x128xf32>
    %150 = arith.truncf %149 : vector<8x128xf32> to vector<8x128xbf16>
    %c0_59 = arith.constant 0 : index
    %c0_60 = arith.constant 0 : index
    %151 = vector.load %arg11[%c0_59, %c0_60] : memref<128x32xbf16, #tpu.memory_space<vmem>>, vector<128x32xbf16>
    %cst_61 = arith.constant dense<0.000000e+00> : vector<8x32xf32>
    %152 = tpu.matmul %150, %151, %cst_61 {dimension_numbers = #tpu.dot_dimension_numbers<[1], [0], [0], [1], [0, 0, 1, 1], [], []>} : vector<8x128xbf16>, vector<128x32xbf16>, vector<8x32xf32> -> vector<8x32xf32>
    %c0_62 = arith.constant 0 : index
    %c0_63 = arith.constant 0 : index
    %153 = vector.load %arg12[%c0_62, %c0_63] : memref<1x32xf32, #tpu.memory_space<vmem>>, vector<1x32xf32>
    %154 = vector.broadcast %153 : vector<1x32xf32> to vector<8x32xf32>
    %155 = arith.addf %152, %154 : vector<8x32xf32>
    %156 = arith.addf %113, %155 : vector<8x32xf32>
    %c0_64 = arith.constant 0 : index
    %c0_65 = arith.constant 0 : index
    %c0_66 = arith.constant 0 : index
    %157 = vector.load %arg13[%c0_64, %c0_65, %c0_66] : memref<1x8x32xf32, #tpu.memory_space<vmem>>, vector<1x8x32xf32>
    %158 = vector.shape_cast %157 : vector<1x8x32xf32> to vector<8x32xf32>
    %159 = vector.shape_cast %156 : vector<8x32xf32> to vector<1x8x32xf32>
    tpu.vector_store %arg13[%c0_64, %c0_65, %c0_66], %159 {strides = array<i32>} : memref<1x8x32xf32, #tpu.memory_space<vmem>>, vector<1x8x32xf32>,
    return
  }
  func.func @transform_0(%arg0: i32) -> (i32, i32, i32) {
    %c0_i32 = arith.constant 0 : i32
    %c0_i32_0 = arith.constant 0 : i32
    %c0_i32_1 = arith.constant 0 : i32
    return %arg0, %c0_i32, %c0_i32_0 : i32, i32, i32
  }
  func.func @transform_1(%arg0: i32) -> (i32, i32) {
    %c0_i32 = arith.constant 0 : i32
    %c0_i32_0 = arith.constant 0 : i32
    %c0_i32_1 = arith.constant 0 : i32
    return %c0_i32, %c0_i32_0 : i32, i32
  }
  func.func @transform_2(%arg0: i32) -> (i32, i32) {
    %c0_i32 = arith.constant 0 : i32
    %c0_i32_0 = arith.constant 0 : i32
    %c0_i32_1 = arith.constant 0 : i32
    return %c0_i32, %c0_i32_0 : i32, i32
  }
  func.func @transform_3(%arg0: i32) -> (i32, i32) {
    %c0_i32 = arith.constant 0 : i32
    %c0_i32_0 = arith.constant 0 : i32
    %c0_i32_1 = arith.constant 0 : i32
    return %c0_i32, %c0_i32_0 : i32, i32
  }
  func.func @transform_4(%arg0: i32) -> (i32, i32) {
    %c0_i32 = arith.constant 0 : i32
    %c0_i32_0 = arith.constant 0 : i32
    %c0_i32_1 = arith.constant 0 : i32
    return %c0_i32, %c0_i32_0 : i32, i32
  }
  func.func @transform_5(%arg0: i32) -> (i32, i32) {
    %c0_i32 = arith.constant 0 : i32
    %c0_i32_0 = arith.constant 0 : i32
    %c0_i32_1 = arith.constant 0 : i32
    return %c0_i32, %c0_i32_0 : i32, i32
  }
  func.func @transform_6(%arg0: i32) -> (i32, i32) {
    %c0_i32 = arith.constant 0 : i32
    %c0_i32_0 = arith.constant 0 : i32
    %c0_i32_1 = arith.constant 0 : i32
    return %c0_i32, %c0_i32_0 : i32, i32
  }
  func.func @transform_7(%arg0: i32) -> (i32, i32) {
    %c0_i32 = arith.constant 0 : i32
    %c0_i32_0 = arith.constant 0 : i32
    %c0_i32_1 = arith.constant 0 : i32
    return %c0_i32, %c0_i32_0 : i32, i32
  }
  func.func @transform_8(%arg0: i32) -> (i32, i32) {
    %c0_i32 = arith.constant 0 : i32
    %c0_i32_0 = arith.constant 0 : i32
    %c0_i32_1 = arith.constant 0 : i32
    return %c0_i32, %c0_i32_0 : i32, i32
  }
  func.func @transform_9(%arg0: i32) -> (i32, i32) {
    %c0_i32 = arith.constant 0 : i32
    %c0_i32_0 = arith.constant 0 : i32
    %c0_i32_1 = arith.constant 0 : i32
    return %c0_i32, %c0_i32_0 : i32, i32
  }
  func.func @transform_10(%arg0: i32) -> (i32, i32) {
    %c0_i32 = arith.constant 0 : i32
    %c0_i32_0 = arith.constant 0 : i32
    %c0_i32_1 = arith.constant 0 : i32
    return %c0_i32, %c0_i32_0 : i32, i32
  }
  func.func @transform_11(%arg0: i32) -> (i32, i32) {
    %c0_i32 = arith.constant 0 : i32
    %c0_i32_0 = arith.constant 0 : i32
    %c0_i32_1 = arith.constant 0 : i32
    return %c0_i32, %c0_i32_0 : i32, i32
  }
  func.func @transform_12(%arg0: i32) -> (i32, i32, i32) {
    %c0_i32 = arith.constant 0 : i32
    %c0_i32_0 = arith.constant 0 : i32
    %c0_i32_1 = arith.constant 0 : i32
    return %arg0, %c0_i32, %c0_i32_0 : i32, i32, i32
  }
}

</mosaic_0001>

<bundles_post_ra>
// kernel: tpu_custom_call.1
= control target key start
LH: loop header
LB: loop body
LE: loop exit
PB: predicated region body
PF: predicated region fallthrough
CT: control target
= control target key end

     0   :  { %s2005_s0 = inlined_call_operand.vmem [shape: f32[2,8,32], index: 0, kind: input, shape index: {}]   ;;  %s2006_s1 = inlined_call_operand.vmem [shape: bf16[32,96], index: 1, kind: input, shape index: {}]   ;;  %s2007_s2 = inlined_call_operand.vmem [shape: bf16[32,32], index: 2, kind: input, shape index: {}]   ;;  %s2008_s3 = inlined_call_operand.vmem [shape: f32[1,32], index: 3, kind: input, shape index: {}]   ;;  %s2009_s4 = inlined_call_operand.vmem [shape: f32[1,32], index: 4, kind: input, shape index: {}]   ;;  %s2010_s5 = inlined_call_operand.vmem [shape: f32[1,32], index: 5, kind: input, shape index: {}]   ;;  %s2011_s6 = inlined_call_operand.vmem [shape: f32[1,32], index: 6, kind: input, shape index: {}]   ;;  %s2012_s7 = inlined_call_operand.vmem [shape: f32[1,32], index: 7, kind: input, shape index: {}]   ;;  %s2013_s8 = inlined_call_operand.vmem [shape: bf16[32,128], index: 8, kind: input, shape index: {}]   ;;  %s2014_s9 = inlined_call_operand.vmem [shape: f32[1,128], index: 9, kind: input, shape index: {}]   ;;  %s2015_s10 = inlined_call_operand.vmem [shape: bf16[128,32], index: 10, kind: input, shape index: {}]   ;;  %s2016_s11 = inlined_call_operand.vmem [shape: f32[1,32], index: 11, kind: input, shape index: {}]   ;;  %s2017_s12 = inlined_call_operand.hbm [shape: f32[2,8,32], index: 12, kind: output, shape index: {}]  }
   0x1   :  { %2018 = sst [smem:[#allocation6_spill]] %s2005_s0 }
   0x2   :  { %2019 = sst [smem:[#allocation7_spill]] %s2006_s1 }
   0x3   :  { %17 = vsyncpa [#allocation4], 0 }
   0x4   :  { %19 = vsyncpa [#allocation4 + $0x1], 0  ;;  %s1744_s21 = smov 0   ;;  %s1746_s22 = smov 0  }
   0x5   :  { %s1748_s23 = smov 0   ;;  %s1750_s24 = smov 0  }
   0x6 LB: > { %s1765_s25 = sadd.s32 4294967295, %s1660_s24   ;;  %s1333_s26 = sadd.s32 4294967294, %s1660_s24   ;;  %s1660_s24 = sphi %s1750_s24, %s2027_s24   ;;  %s1656_s23 = sphi %s1748_s23, %s2026_s23   ;;  %s1652_s22 = sphi %s1746_s22, %s2025_s22   ;;  %s1648_s21 = sphi %s1744_s21, %s2024_s21  }
   0x7   : > { %s1769_s27 = sadd.s32 1, %s1660_s24   ;;  %s289_s28 = sadd.s32 1, %s1656_s23 }
   0x8   : > { %s286_s29 = ssub.s32 %s1660_s24, %s1769_s27  ;;  %p299_p0 = scmp.ne.s32.totalorder %s1656_s23, %s1652_s22 }
   0x9   : > { %p287_p1 = scmp.eq.s32.totalorder %s286_s29, 0  ;;  %p300_p2 = scmp.eq.s32.totalorder %s1765_s25, 1 }
   0xa   : > { %p305_p3 = scmp.ne.s32.totalorder %s1652_s22, %s1648_s21  ;;  %p306_p4 = scmp.eq.s32.totalorder %s1333_s26, 1 }
   0xb   : > { %s1780_s30 = scalar_select %p287_p1, %s1656_s23, %s289_s28  }
   0xc   : > { %p1782_p5 = por %p300_p2, %p299_p0  ;;  %p1786_p6 = por %p306_p4, %p305_p3 }
   0xd   : > { %p1336_p7 = scmp.ge.s32.totalorder %s1660_s24, 1  ;;  %p364_p8 = scmp.lt.s32.totalorder %s1660_s24, 3 }
   0xf   : > { %p365_p9 = pnand %p1336_p7, %p364_p8 }
  0x10   : > { %p405_p10 = scmp.lt.s32.totalorder (!%p365_p9), %s1765_s25, 1  ;;  %vm413_vm0 = vcmask (!%p365_p9), 261120   ;;  %s2022_s0 = sld [smem:[#allocation6_spill]] (!%p365_p9)  ;;  %v1662_v8 = vmov (!%p365_p9), 0.0   ;;  %vm1663_vm1 = vmmov (!%p365_p9), 0   ;;  %vm508_vm2 = vcmask (!%p365_p9), 64512  }
  0x11   : > { %368 = sbr.rel (%p365_p9) target bundleno = 2601 (0xa29), region = 68  ;;  %s2023_s1 = sld [smem:[#allocation7_spill]] (!%p365_p9)  ;;  %1415 = vmatprep.subr.bf16.mxu0 (!%p365_p9), %v1662_v8  ;;  %1419 = vmatprep.mubr.msk.bf16.mxu0 (!%p365_p9), %vm1663_vm1, %v1662_v8  ;;  %v1339_v14 = vld [vmem:[%s2009_s4] ss:$0 sm:$0xff] (!%p365_p9)  ;;  %vm572_vm3 = vcmask (!%p365_p9), 1043456   ;;  %vm617_vm4 = vcmask (!%p365_p9), 60416  }
  0x12   : > { %1435 = vmatprep.subr.bf16.mxu1 (!%p365_p9), %v1662_v8  ;;  %1437 = vmatprep.mubr.msk.bf16.mxu1 (!%p365_p9), %vm1663_vm1, %v1662_v8  ;;  %v1340_v16 = vld [vmem:[%s2010_s5] ss:$0 sm:$0xff] (!%p365_p9)  ;;  %s1665_s20 = smov (!%p365_p9), 120   ;;  %s1666_s26 = smov (!%p365_p9), 88   ;;  %vm737_vm5 = vcmask (!%p365_p9), 126016   ;;  %vm856_vm6 = vcmask (!%p365_p9), 191616  }
  0x13   : > { %s1667_s28 = smov (!%p365_p9), 80   ;;  %s1668_s29 = smov (!%p365_p9), 112   ;;  %vm975_vm7 = vcmask (!%p365_p9), 257216  }
  0x14   : > { %s1671_s17 = smov (!%p365_p9), 64   ;;  %s1672_s18 = smov (!%p365_p9), 56  }
  0x17   : > { %v1562_v7 = vld [vmem:[%s2023_s1] sm:$0xff] (!%p365_p9)   ;;  %v1563_v9 = vld [vmem:[%s2023_s1 + $0x8] sm:$0xff] (!%p365_p9)  }
  0x18   : > { %s406_s15 = scalar_select %p405_p10, %s1765_s25, 1  ;;  %1416 = vmatpush3.bf16.msra.mxu0 %v1562_v7 }
  0x19   : > { %1417 = vmatprep.subr.bf16.mxu0 %v1662_v8 }
  0x1a   : > { %s1338_s16 = sshll.u32 %s406_s15, 3  ;;  %s1669_s15 = smov 72  }
  0x1b   : > { %s408_s19 = scalar_lea.vmem %s2022_s0, %s1338_s16  ;;  %s1670_s16 = smov 104  }
  0x1c   : > { %v1797_v0 = vld [vmem:[%s408_s19] sm:$0xff]  ;;  %1418 = vmatpush3.bf16.msra.mxu0 %v1563_v9  ;;  %s1664_s19 = smov 96  }
  0x1d   : > { %v414_v1 = vsel %vm413_vm0, %v1797_v0, 0.0  ;;  %1423 = vmatprep.subr.bf16.mxu0 %v1662_v8 }
  0x1e   : > { %415 = vadd.xlane.f32.xlu0 %v414_v1 }
  0xab   : > { %v416_v2 = vpop.xlane.xlu0 %415 }
  0xac   : > { %v418_v3 = vmul.f32 0.03125, %v416_v2 }
  0xae   : > { %v419_v4 = vsub.f32 %v1797_v0, %v418_v3 }
  0xb0   : > { %v420_v5 = vmul.f32 %v419_v4, %v419_v4 }
  0xb2   : > { %v421_v6 = vsel %vm413_vm0, %v420_v5, 0.0 }
  0xb3   : > { %422 = vadd.xlane.f32.xlu0 %v421_v6 }
 0x140   : > { %v423_v10 = vpop.xlane.xlu0 %422 }
 0x141   : > { %v424_v11 = vmul.f32 0.03125, %v423_v10 }
 0x143   : > { %v425_v12 = vadd.f32 1e-05, %v424_v11 }
 0x145   : > { %1576 = vrsqrt.f32 %v425_v12 }
 0x14f   : > { %v1577_v13 = vpop.eup %1576 }
 0x150   : > { %v427_v15 = vmul.f32 %v1577_v13, %v419_v4 }
 0x152   : > { %v434_v17 = vmul.f32 %v1339_v14, %v427_v15 }
 0x154   : > { %v441_v18 = vadd.f32 %v1340_v16, %v434_v17 }
 0x156   : > { %v442_v19 = vpack.c.bf16 %v441_v18, %v441_v18 }
 0x158   : > { %1420 = vmatmul.mubr.msk.bf16.vlgmr.msra.gmra.mrb[0].mxu0 %vm413_vm0, %v442_v19 }
 0x159   : > { %1425 = vmatprep.mubr.msk.bf16.mxu0 %vm1663_vm1, %v1662_v8 }
 0x22b   : > { %v496_v20 = vpop.f32.mrb[0].mxu0 }
 0x22c   : > { %v502_v21 = vmul.f32 0.35355338, %v496_v20  ;;  %v1826_v22 = vpack.c.bf16 %v496_v20, %v496_v20  ;;  %v1421_v23 = vpop.f32.mrb[1].mxu0 }
 0x22d   : > { %v499_v24 = vpop.f32.mrb[2].mxu0 }
 0x22e   : > { %v503_v25 = vpack.c.bf16 %v502_v21, %v502_v21  ;;  %506 = vrot.lane.b32.xlu1 %v1826_v22, %s1664_s19  ;;  %v1422_v26 = vpop.f32.mrb[3].mxu0  ;;  %s1673_s19 = smov 48  }
 0x230   : > { %620 = vrot.lane.b32.xlu0 %v503_v25, %s1665_s20  ;;  %s1674_s20 = smov 40  }
 0x232   : > { %622 = vrot.lane.b32.xlu1 %v1826_v22, %s1666_s26  ;;  %s1675_s26 = smov 8  }
 0x236   : > { %741 = vrot.lane.b32.xlu1 %v1826_v22, %s1667_s28  ;;  %s1678_s28 = smov [#allocation3]  }
 0x23a   : > { %739 = vrot.lane.b32.xlu1 %v503_v25, %s1668_s29  ;;  %s1602_s29 = sshll.u32 %s1678_s28, 4  ;;  %s1603_s29 = int_to_ptr.vmem [resolvable:$false] %s1602_s29 }
 0x23b   : > { %s1604_s1 = scalar_lea.vmem %s1603_s29, 256 }
 0x23e   : > { %860 = vrot.lane.b32.xlu1 %v1826_v22, %s1669_s15  ;;  %s1375_s15 = sshll.u32 %s1765_s25, 7 }
 0x23f   : > { %s1962_s0 = scalar_lea.hbm %s2017_s12, %s1375_s15 }
 0x242   : > { %858 = vrot.lane.b32.xlu1 %v503_v25, %s1670_s16 }
 0x2a0   : > { %v507_v27 = vpop.permute.xlu1 %506 }
 0x2a1   : > { %v513_v28 = vsel %vm508_vm2, %v507_v27, 0 }
 0x2a2   : > { %1424 = vmatpush3.bf16.xpose.msra.mxu0 %v513_v28  ;;  %v621_v32 = vpop.permute.xlu0 %620 }
 0x2a3   : > { %1429 = vmatprep.subr.bf16.mxu0 %v1662_v8 }
 0x2a4   : > { %v623_v29 = vpop.permute.xlu1 %622 }
 0x2a5   : > { %v628_v30 = vsel %vm508_vm2, %v623_v29, 0 }
 0x2a6   : > { %1436 = vmatpush3.bf16.xpose.msra.mxu1 %v628_v30 }
 0x2a7   : > { %1447 = vmatprep.subr.bf16.mxu1 %v1662_v8 }
 0x2a8   : > { %v742_v31 = vpop.permute.xlu1 %741 }
 0x2a9   : > { %1426 = vmatmul.mubr.msk.bf16.vlgmr.msra.gmra.mrb[4].mxu0 %vm508_vm2, %v503_v25  ;;  %v747_v34 = vsel %vm508_vm2, %v742_v31, 0 }
 0x2aa   : > { %1431 = vmatprep.mubr.msk.bf16.mxu0 %vm1663_vm1, %v1662_v8 }
 0x2ac   : > { %v740_v33 = vpop.permute.xlu1 %739 }
 0x2ad   : > { %1438 = vmatmul.mubr.msk.bf16.vlgmr.msra.gmra.mrb[0].mxu1 %vm508_vm2, %v621_v32 }
 0x2ae   : > { %1448 = vmatpush3.bf16.xpose.msra.mxu1 %v747_v34  ;;  %1449 = vmatprep.mubr.msk.bf16.mxu1 %vm1663_vm1, %v1662_v8 }
 0x2af   : > { %1459 = vmatprep.subr.bf16.mxu1 %v1662_v8 }
 0x2b0   : > { %v861_v35 = vpop.permute.xlu1 %860 }
 0x2b1   : > { %v866_v36 = vsel %vm508_vm2, %v861_v35, 0 }
 0x2b4   : > { %v859_v37 = vpop.permute.xlu1 %858 }
 0x2b5   : > { %1450 = vmatmul.mubr.msk.bf16.vlgmr.msra.gmra.mrb[4].mxu1 %vm508_vm2, %v740_v33 }
 0x2b6   : > { %1460 = vmatpush3.bf16.xpose.msra.mxu1 %v866_v36  ;;  %1461 = vmatprep.mubr.msk.bf16.mxu1 %vm1663_vm1, %v1662_v8 }
 0x2b7   : > { %1471 = vmatprep.subr.bf16.mxu1 %v1662_v8 }
 0x2bd   : > { %1462 = vmatmul.mubr.msk.bf16.vlgmr.msra.gmra.mrb[8].mxu1 %vm508_vm2, %v859_v37 }
 0x2be   : > { %1475 = vmatprep.mubr.msk.bf16.mxu1 %vm1663_vm1, %v1662_v8 }
 0x37c   : > { %v549_v38 = vpop.f32.mrb[4].mxu0 }
 0x37d   : > { %v1427_v39 = vpop.f32.mrb[5].mxu0  ;;  %v555_v40 = vsel %vm508_vm2, %v549_v38, -inf }
 0x37e   : > { %556 = vmax.xlane.f32.xlu1 %v555_v40  ;;  %v552_v41 = vpop.f32.mrb[6].mxu0 }
 0x37f   : > { %v1428_v42 = vpop.f32.mrb[7].mxu0 }
 0x380   : > { %v664_v43 = vpop.f32.mrb[0].mxu1 }
 0x381   : > { %v1439_v44 = vpop.f32.mrb[1].mxu1  ;;  %v670_v45 = vsel %vm508_vm2, %v664_v43, -inf }
 0x382   : > { %671 = vmax.xlane.f32.xlu0 %v670_v45  ;;  %v667_v46 = vpop.f32.mrb[2].mxu1 }
 0x383   : > { %v1440_v47 = vpop.f32.mrb[3].mxu1 }
 0x388   : > { %v783_v48 = vpop.f32.mrb[4].mxu1 }
 0x389   : > { %v1451_v49 = vpop.f32.mrb[5].mxu1  ;;  %v789_v50 = vsel %vm508_vm2, %v783_v48, -inf }
 0x38a   : > { %v786_v51 = vpop.f32.mrb[6].mxu1  ;;  %790 = vmax.xlane.f32.xlu1 %v789_v50  ;;  %v1564_v50 = vld [vmem:[%s2007_s2] sm:$0xff]  }
 0x38b   : > { %v1452_v52 = vpop.f32.mrb[7].mxu1  ;;  %1472 = vmatpush3.bf16.msra.mxu1 %v1564_v50 }
 0x38c   : > { %v1565_v52 = vld [vmem:[%s2007_s2 + $0x8] sm:$0xff]   ;;  %1473 = vmatprep.subr.bf16.mxu1 %v1662_v8 }
 0x38f   : > { %1474 = vmatpush3.bf16.msra.mxu1 %v1565_v52 }
 0x390   : > { %v902_v53 = vpop.f32.mrb[8].mxu1  ;;  %1487 = vmatprep.subr.bf16.mxu1 %v1662_v8 }
 0x391   : > { %v1463_v54 = vpop.f32.mrb[9].mxu1  ;;  %v908_v55 = vsel %vm508_vm2, %v902_v53, -inf }
 0x392   : > { %909 = vmax.xlane.f32.xlu0 %v908_v55  ;;  %v905_v56 = vpop.f32.mrb[10].mxu1 }
 0x393   : > { %v1464_v57 = vpop.f32.mrb[11].mxu1 }
 0x40b   : > { %v557_v58 = vpop.xlane.xlu1 %556 }
 0x40c   : > { %v558_v59 = vsub.f32 %v549_v38, %v557_v58 }
 0x40e   : > { %v559_v60 = vmul.f32 1.442695, %v558_v59 }
 0x40f   : > { %v672_v61 = vpop.xlane.xlu0 %671 }
 0x410   : > { %1578 = vpow2.f32 %v559_v60  ;;  %v673_v62 = vsub.f32 %v664_v43, %v672_v61 }
 0x412   : > { %v674_v63 = vmul.f32 1.442695, %v673_v62 }
 0x414   : > { %1580 = vpow2.f32 %v674_v63 }
 0x417   : > { %v791_v11 = vpop.xlane.xlu1 %790 }
 0x418   : > { %v792_v12 = vsub.f32 %v783_v48, %v791_v11 }
 0x41a   : > { %v1579_v1 = vpop.eup %1578  ;;  %v793_v13 = vmul.f32 1.442695, %v792_v12 }
 0x41b   : > { %v561_v2 = vsel %vm508_vm2, %v1579_v1, 0.0 }
 0x41c   : > { %562 = vadd.xlane.f32.xlu1 %v561_v2 }
 0x41e   : > { %v1581_v3 = vpop.eup %1580 }
 0x41f   : > { %v910_v4 = vpop.xlane.xlu0 %909  ;;  %v676_v5 = vsel %vm508_vm2, %v1581_v3, 0.0 }
 0x420   : > { %v911_v6 = vsub.f32 %v902_v53, %v910_v4  ;;  %677 = vadd.xlane.f32.xlu0 %v676_v5 }
 0x422   : > { %v912_v7 = vmul.f32 1.442695, %v911_v6 }
 0x424   : > { %1582 = vpow2.f32 %v912_v7 }
 0x425   : > { %1584 = vpow2.f32 %v793_v13 }
 0x42d   : > { %567 = vrot.lane.b32.xlu1 %v1826_v22, %s1671_s17  ;;  %s1676_s17 = smov 16  }
 0x42e   : > { %v1583_v9 = vpop.eup %1582 }
 0x42f   : > { %v914_v10 = vsel %vm508_vm2, %v1583_v9, 0.0  ;;  %v1585_v14 = vpop.eup %1584 }
 0x430   : > { %915 = vadd.xlane.f32.xlu0 %v914_v10  ;;  %v795_v15 = vsel %vm508_vm2, %v1585_v14, 0.0 }
 0x446   : > { %682 = vrot.lane.b32.xlu0 %v1826_v22, %s1672_s18  ;;  %s1677_s18 = smov 24  }
 0x451   : > { %796 = vadd.xlane.f32.xlu1 %v795_v15 }
 0x462   : > { %801 = vrot.lane.b32.xlu1 %v1826_v22, %s1673_s19 }
 0x466   : > { %920 = vrot.lane.b32.xlu1 %v1826_v22, %s1674_s20  ;;  %s402_s20 = sand.u32 1, %s1652_s22  }
 0x467   : > { %s1261_s25 = scalar_lea.sflag [#allocation4], %s402_s20 }
 0x4a9   : > { %v563_v16 = vpop.xlane.xlu1 %562 }
 0x4aa   : > { %1586 = vrcp.f32 %v563_v16 }
 0x4ad   : > { %v568_v17 = vpop.permute.xlu1 %567  ;;  %v678_v19 = vpop.xlane.xlu0 %677 }
 0x4ae   : > { %v574_v18 = vsel %vm572_vm3, %v568_v17, 0  ;;  %1588 = vrcp.f32 %v678_v19  ;;  %v1566_v17 = vld [vmem:[%s2013_s8] sm:$0xff]   ;;  %v1569_v19 = vld [vmem:[%s2015_s10 + $0x8] sm:$0xff]  }
 0x4af   : > { %1430 = vmatpush3.bf16.msra.mxu0 %v574_v18  ;;  %v1568_v18 = vld [vmem:[%s2015_s10] sm:$0xff]  }
 0x4b0   : > { %1441 = vmatprep.subr.bf16.mxu0 %v1662_v8 }
 0x4b4   : > { %v1587_v20 = vpop.eup %1586 }
 0x4b5   : > { %v565_v21 = vmul.f32 %v1587_v20, %v1579_v1  ;;  %v1570_v20 = vld [vmem:[%s2015_s10 + $0x10] sm:$0xff]  }
 0x4b7   : > { %v566_v23 = vpack.c.bf16 %v565_v21, %v565_v21 }
 0x4b8   : > { %v1589_v22 = vpop.eup %1588 }
 0x4b9   : > { %1432 = vmatmul.mubr.msk.bf16.vlgmr.msra.gmra.mrb[8].mxu0 %vm508_vm2, %v566_v23  ;;  %v680_v25 = vmul.f32 %v1589_v22, %v1581_v3  ;;  %v1355_v3 = vld [vmem:[%s2008_s3] ss:$0 sm:$0xff] }
 0x4ba   : > { %1443 = vmatprep.mubr.msk.bf16.mxu0 %vm1663_vm1, %v1662_v8 }
 0x4bb   : > { %v681_v28 = vpack.c.bf16 %v680_v25, %v680_v25  ;;  %v1359_v25 = vld [vmem:[%s2011_s6] ss:$0 sm:$0xff] }
 0x4bd   : > { %v916_v24 = vpop.xlane.xlu0 %915 }
 0x4c1   : > { %v683_v26 = vpop.permute.xlu0 %682 }
 0x4c2   : > { %v688_v27 = vsel %vm572_vm3, %v683_v26, 0 }
 0x4c3   : > { %1442 = vmatpush3.bf16.msra.mxu0 %v688_v27  ;;  %v1360_v27 = vld [vmem:[%s2012_s7] ss:$0 sm:$0xff] }
 0x4c4   : > { %1453 = vmatprep.subr.bf16.mxu0 %v1662_v8 }
 0x4c6   : > { %1444 = vmatmul.mubr.msk.bf16.vlgmr.msra.gmra.mrb[12].mxu0 %vm508_vm2, %v681_v28 }
 0x4c7   : > { %1455 = vmatprep.mubr.msk.bf16.mxu0 %vm1663_vm1, %v1662_v8 }
 0x4de   : > { %v797_v29 = vpop.xlane.xlu1 %796 }
 0x4df   : > { %1590 = vrcp.f32 %v797_v29 }
 0x4e0   : > { %1592 = vrcp.f32 %v916_v24 }
 0x4e2   : > { %v802_v30 = vpop.permute.xlu1 %801 }
 0x4e3   : > { %v807_v31 = vsel %vm572_vm3, %v802_v30, 0 }
 0x4e4   : > { %1454 = vmatpush3.bf16.msra.mxu0 %v807_v31  ;;  %v1571_v31 = vld [vmem:[%s2015_s10 + $0x18] sm:$0xff]  }
 0x4e5   : > { %1465 = vmatprep.subr.bf16.mxu0 %v1662_v8 }
 0x4e6   : > { %v921_v34 = vpop.permute.xlu1 %920 }
 0x4e7   : > { %v926_v37 = vsel %vm572_vm3, %v921_v34, 0  ;;  %v1574_v34 = vld [vmem:[%s2015_s10 + $0x30] sm:$0xff]  }
 0x4e9   : > { %v1591_v32 = vpop.eup %1590 }
 0x4ea   : > { %v799_v33 = vmul.f32 %v1591_v32, %v1585_v14  ;;  %v1593_v36 = vpop.eup %1592  ;;  %v1572_v32 = vld [vmem:[%s2015_s10 + $0x20] sm:$0xff]  }
 0x4eb   : > { %v918_v38 = vmul.f32 %v1593_v36, %v1583_v9  ;;  %v1361_v36 = vld [vmem:[%s2014_s9] ss:$0 sm:$0xff] }
 0x4ec   : > { %v800_v35 = vpack.c.bf16 %v799_v33, %v799_v33  ;;  %v1573_v33 = vld [vmem:[%s2015_s10 + $0x28] sm:$0xff]  }
 0x4ed   : > { %v919_v39 = vpack.c.bf16 %v918_v38, %v918_v38 }
 0x4ee   : > { %1456 = vmatmul.mubr.msk.bf16.vlgmr.msra.gmra.mrb[16].mxu0 %vm508_vm2, %v800_v35  ;;  %v1575_v35 = vld [vmem:[%s2015_s10 + $0x38] sm:$0xff]  }
 0x4ef   : > { %1466 = vmatpush3.bf16.msra.mxu0 %v926_v37  ;;  %1467 = vmatprep.mubr.msk.bf16.mxu0 %vm1663_vm1, %v1662_v8 }
 0x4f0   : > { %1479 = vmatprep.subr.bf16.mxu0 %v1662_v8 }
 0x4f6   : > { %1468 = vmatmul.mubr.msk.bf16.vlgmr.msra.gmra.mrb[20].mxu0 %vm508_vm2, %v919_v39 }
 0x4f7   : > { %1483 = vmatprep.mubr.msk.bf16.mxu0 %vm1663_vm1, %v1662_v8  ;;  %1480 = vmatpush3.bf16.msra.mxu0 %v1566_v17 }
 0x4f8   : > { %1481 = vmatprep.subr.bf16.mxu0 %v1662_v8 }
 0x58c   : > { %v610_v40 = vpop.f32.mrb[8].mxu0 }
 0x58d   : > { %v616_v41 = vpack.c.bf16 %v610_v40, %v610_v40  ;;  %v1433_v42 = vpop.f32.mrb[9].mxu0 }
 0x58e   : > { %v613_v43 = vpop.f32.mrb[10].mxu0 }
 0x58f   : > { %618 = vst.msk [vmem:[#allocation2] sm:$0xf] %vm617_vm4, %v616_v41  ;;  %v1434_v44 = vpop.f32.mrb[11].mxu0 }
 0x599   : > { %v724_v45 = vpop.f32.mrb[12].mxu0 }
 0x59a   : > { %v1378_v46 = vpack.c.bf16 %v724_v45, %v724_v45  ;;  %v1445_v47 = vpop.f32.mrb[13].mxu0 }
 0x59b   : > { %v727_v48 = vpop.f32.mrb[14].mxu0  ;;  %v1365_v47 = vld [vmem:[%s2016_s11] ss:$0 sm:$0xff] }
 0x59c   : > { %734 = vrot.lane.b32.xlu0 %v1378_v46, %s1675_s26  ;;  %v1446_v49 = vpop.f32.mrb[15].mxu0  ;;  %s1337_s26 = sshll.u32 %s402_s20, 3 }
 0x59d   : > { %s404_s16 = scalar_lea.vmem [#allocation3], %s1337_s26 }
 0x5c1   : > { %v843_v51 = vpop.f32.mrb[16].mxu0 }
 0x5c2   : > { %v1379_v53 = vpack.c.bf16 %v843_v51, %v843_v51  ;;  %v1457_v54 = vpop.f32.mrb[17].mxu0 }
 0x5c3   : > { %v846_v55 = vpop.f32.mrb[18].mxu0 }
 0x5c4   : > { %853 = vrot.lane.b32.xlu1 %v1379_v53, %s1676_s17  ;;  %v1458_v56 = vpop.f32.mrb[19].mxu0  ;;  %s1274_s17 = sshll.u32 %s404_s16, 4  ;;  %s1964_s17 = int_to_ptr.vmem [resolvable:$true] %s1274_s17 }
 0x5c5   : > { %s1598_s26 = scalar_lea.vmem %s1964_s17, 128  ;;  %p1605_p0 = scmp.lt.s32.totalorder %s1964_s17, %s1603_s29 }
 0x5c6   : > { %p1599_p11 = scmp.ne.s32.totalorder %s1964_s17, %s1598_s26  ;;  %p1606_p1 = scmp.lt.s32.totalorder %s1604_s1, %s1598_s26 }
 0x5c8   : > { %p1600_p12 = pnand %p1599_p11, %p1782_p5  ;;  %p1607_p2 = por %p1606_p1, %p1605_p0 }
 0x5c9   : > { %v962_v57 = vpop.f32.mrb[20].mxu0 }
 0x5ca   : > { %v1380_v58 = vpack.c.bf16 %v962_v57, %v962_v57  ;;  %v1469_v59 = vpop.f32.mrb[21].mxu0  ;;  %p1601_p13 = pneg %p1600_p12 }
 0x5cb   : > { %v965_v60 = vpop.f32.mrb[22].mxu0 }
 0x5cc   : > { %972 = vrot.lane.b32.xlu0 %v1380_v58, %s1677_s18  ;;  %v1470_v61 = vpop.f32.mrb[23].mxu0  ;;  %p1608_p3 = pnand %p1607_p2, %p1601_p13 }
 0x60e   : > { %v735_v62 = vpop.permute.xlu0 %734 }
 0x60f   : > { %738 = vst.msk [vmem:[#allocation2] sm:$0xf] %vm737_vm5, %v735_v62 }
 0x636   : > { %v854_v63 = vpop.permute.xlu1 %853 }
 0x637   : > { %857 = vst.msk [vmem:[#allocation2] sm:$0xf] %vm856_vm6, %v854_v63 }
 0x63e   : > { %v973_v1 = vpop.permute.xlu0 %972 }
 0x63f   : > { %976 = vst.msk [vmem:[#allocation2] sm:$0xf] %vm975_vm7, %v973_v1 }
 0x646   : > { %v977_v2 = vld [vmem:[#allocation2] sm:$0xf] }
 0x647   : > { %1476 = vmatmul.mubr.msk.bf16.vlgmr.msra.gmra.mrb[12].mxu1 %vm413_vm0, %v977_v2 }
 0x648   : > { %1503 = vmatprep.mubr.msk.bf16.mxu1 %vm1663_vm1, %v1662_v8  ;;  %1488 = vmatpush3.bf16.msra.mxu1 %v1568_v18 }
 0x649   : > { %1489 = vmatprep.subr.bf16.mxu1 %v1662_v8 }
 0x64c   : > { %1490 = vmatpush3.bf16.msra.mxu1 %v1569_v19 }
 0x64d   : > { %1491 = vmatprep.subr.bf16.mxu1 %v1662_v8 }
 0x650   : > { %1492 = vmatpush3.bf16.msra.mxu1 %v1570_v20 }
 0x651   : > { %1493 = vmatprep.subr.bf16.mxu1 %v1662_v8 }
 0x654   : > { %1494 = vmatpush3.bf16.msra.mxu1 %v1571_v31 }
 0x655   : > { %1495 = vmatprep.subr.bf16.mxu1 %v1662_v8 }
 0x658   : > { %1496 = vmatpush3.bf16.msra.mxu1 %v1572_v32 }
 0x659   : > { %1497 = vmatprep.subr.bf16.mxu1 %v1662_v8 }
 0x65c   : > { %1498 = vmatpush3.bf16.msra.mxu1 %v1573_v33 }
 0x65d   : > { %1499 = vmatprep.subr.bf16.mxu1 %v1662_v8 }
 0x660   : > { %1500 = vmatpush3.bf16.msra.mxu1 %v1574_v34 }
 0x661   : > { %1501 = vmatprep.subr.bf16.mxu1 %v1662_v8 }
 0x664   : > { %1502 = vmatpush3.bf16.msra.mxu1 %v1575_v35 }
 0x71a   : > { %v1038_v4 = vpop.f32.mrb[12].mxu1 }
 0x71b   : > { %v1039_v5 = vadd.f32 %v1355_v3, %v1038_v4  ;;  %v1477_v6 = vpop.f32.mrb[13].mxu1 }
 0x71c   : > { %v1041_v7 = vpop.f32.mrb[14].mxu1 }
 0x71d   : > { %v1899_v9 = vadd.f32 %v1039_v5, %v1797_v0  ;;  %v1478_v10 = vpop.f32.mrb[15].mxu1  ;;  %v1567_v0 = vld [vmem:[%s2013_s8 + $0x8] sm:$0xff]  }
 0x71e   : > { %1482 = vmatpush3.bf16.msra.mxu0 %v1567_v0 }
 0x71f   : > { %v1047_v11 = vsel %vm413_vm0, %v1899_v9, 0.0 }
 0x720   : > { %1048 = vadd.xlane.f32.xlu1 %v1047_v11 }
 0x7ad   : > { %v1049_v12 = vpop.xlane.xlu1 %1048 }
 0x7ae   : > { %v1050_v13 = vmul.f32 0.03125, %v1049_v12 }
 0x7b0   : > { %v1051_v14 = vsub.f32 %v1899_v9, %v1050_v13 }
 0x7b2   : > { %v1052_v15 = vmul.f32 %v1051_v14, %v1051_v14 }
 0x7b4   : > { %v1053_v16 = vsel %vm413_vm0, %v1052_v15, 0.0 }
 0x7b5   : > { %1054 = vadd.xlane.f32.xlu0 %v1053_v16 }
 0x842   : > { %v1055_v21 = vpop.xlane.xlu0 %1054 }
 0x843   : > { %v1056_v23 = vmul.f32 0.03125, %v1055_v21 }
 0x845   : > { %v1057_v22 = vadd.f32 1e-05, %v1056_v23 }
 0x847   : > { %1594 = vrsqrt.f32 %v1057_v22 }
 0x851   : > { %v1595_v24 = vpop.eup %1594 }
 0x852   : > { %v1059_v26 = vmul.f32 %v1595_v24, %v1051_v14 }
 0x854   : > { %v1066_v28 = vmul.f32 %v1359_v25, %v1059_v26 }
 0x856   : > { %v1073_v29 = vadd.f32 %v1360_v27, %v1066_v28 }
 0x858   : > { %v1074_v30 = vpack.c.bf16 %v1073_v29, %v1073_v29 }
 0x85a   : > { %1484 = vmatmul.mubr.msk.bf16.vlgmr.msra.gmra.mrb[24].mxu0 %vm413_vm0, %v1074_v30 }
 0x92d   : > { %v1135_v37 = vpop.f32.mrb[24].mxu0 }
 0x92e   : > { %v1136_v38 = vadd.f32 %v1361_v36, %v1135_v37  ;;  %v1485_v39 = vpop.f32.mrb[25].mxu0 }
 0x92f   : > { %v1138_v40 = vpop.f32.mrb[26].mxu0 }
 0x930   : > { %v1142_v41 = vmul.f32 0.70710677, %v1136_v38  ;;  %v1486_v42 = vpop.f32.mrb[27].mxu0  ;;  %v1141_v8 = vmul.f32 0.5, %v1136_v38 }
 0x932   : > { %1596 = verf.f32 %v1142_v41 }
 0x93c   : > { %v1597_v43 = vpop.eup %1596 }
 0x93d   : > { %v1144_v44 = vadd.f32 1.0, %v1597_v43 }
 0x93f   : > { %v1145_v45 = vmul.f32 %v1144_v44, %v1141_v8 }
 0x941   : > { %v1146_v46 = vpack.c.bf16 %v1145_v45, %v1145_v45 }
 0x943   : > { %1504 = vmatmul.mubr.bf16.vlgmr.msra.gmra.mrb[16].mxu1 %v1146_v46 }
 0xa16   : > { %v1252_v48 = vpop.f32.mrb[16].mxu1 }
 0xa17   : > { %v1253_v49 = vadd.f32 %v1365_v47, %v1252_v48  ;;  %v1505_v50 = vpop.f32.mrb[17].mxu1 }
 0xa18   : > { %v1255_v51 = vpop.f32.mrb[18].mxu1 }
 0xa19   : > { %v1258_v52 = vadd.f32 %v1253_v49, %v1899_v9  ;;  %v1506_v53 = vpop.f32.mrb[19].mxu1 }
 0xa1b   : > { %1259 = vst.msk [vmem:[%s404_s16] sm:$0xff] %vm413_vm0, %v1258_v52 }
 0xa1c   : > { %1611 = shalt.err (!%p1608_p3)
}
 0xa1d   : > { %s1612_s20 = scalar_lea.hbm %s1962_s0, 128  ;;  %s1616_s18 = scalar_lea.hbm %s2017_s12, 256 }
 0xa1e   : > { %p1613_p4 = scmp.ne.s32.totalorder %s1962_s0, %s1612_s20  ;;  %p1617_p9 = scmp.lt.u32.totalorder %s1962_s0, %s2017_s12 }
 0xa1f   : > { %p1618_p10 = scmp.lt.u32.totalorder %s1616_s18, %s1612_s20  ;;  %p1620_p12 = scmp.lt.u32.totalorder %s1612_s20, %s1962_s0 }
 0xa20   : > { %p1614_p7 = pnand %p1613_p4, %p1782_p5 }
 0xa21   : > { %p1619_p11 = por %p1618_p10, %p1617_p9 }
 0xa22   : > { %p1615_p8 = pneg %p1614_p7 }
 0xa23   : > { %p1621_p13 = por %p1620_p12, %p1619_p11 }
 0xa25   : > { %p1622_p0 = pnand %p1621_p13, %p1615_p8 }
 0xa27   : > { %1625 = shalt.err (!%p1622_p0)
}
 0xa28   : > { %1507 = dma.vmem_to_hbm [thread:$0]  (%p1782_p5), %s1964_s17, 128, %s1962_s0, %s1261_s25  }
 0xa29 PF: > { %p1513_p1 = scmp.ge.s32.totalorder %s1660_s24, 2  ;;  %s1286_s1 = sand.u32 1, %s1648_s21  }
 0xa2a   : > { %s1287_s26 = scalar_lea.sflag [#allocation4], %s1286_s1 }
 0xa2b   : > { %p1510_p2 = pnand %p1513_p1, %p1786_p6 }
 0xa2d   : > { %1643 = dma.done.wait (!%p1510_p2), %s1287_s26, 128  }
 0xa2e   : > { %1645 = vsyncadd (!%p1510_p2), %s1287_s26, 4294967168  ;;  %p22_p3 = scmp.ge.s32.totalorder %s1769_s27, 4   ;;  %s2024_s21 = smov %s1652_s22 }
 0xa2f   : > { %s2025_s22 = smov %s1656_s23  ;;  %s2026_s23 = smov %s1780_s30 }
 0xa30   : > { %s2027_s24 = smov %s1769_s27  ;;  %24 = sbr.rel (!%p22_p3) target bundleno = 6 (0x6), region = 103 }
 0xa37   :  { %1292 = vsyncpa [#allocation4], 1 }
 0xa38   :  { %1294 = vsyncpa [#allocation4 + $0x1], 1 }

</bundles_post_ra>
